<compile_context>
chip_gen: v7x
topology: tpu7x:2x2x1
jax: 0.10.0
libtpu: 0.0.40
codegen_flags: <defaults>
</compile_context>

<pallas_src>
import functools

import jax
import jax.numpy as jnp
from jax.experimental import pallas as pl
from jax.experimental.pallas import tpu as pltpu


# --------------------------------------------------------------------------
# Small-batch path: gridless, lane-dense (batch on lanes), one fused kernel.
# --------------------------------------------------------------------------
def _atloc_small_kernel(x_ref, s_ref, out_ref, *, d):
    # x_ref: (2, D, N) f32 -- x_ref[0] = pred.T, x_ref[1] = targ.T (batch on lanes)
    pred = x_ref[0]                                            # (D, N)
    targ = x_ref[1]                                            # (D, N)

    # Per-component |err| summed over the batch (lane reduction).
    row = jnp.sum(jnp.abs(pred - targ), axis=1, keepdims=True)  # (D, 1)
    t_sum = jnp.sum(row[0:3, :], axis=0, keepdims=True)         # (1, 1)
    q_sum = jnp.sum(row[3:d, :], axis=0, keepdims=True)         # (1, 1)

    sax = s_ref[0]
    saq = s_ref[1]
    w_t = s_ref[2]                                             # exp(-sax)/(3N)
    w_q = s_ref[3]                                             # exp(-saq)/((D-3)N)
    out_ref[...] = w_t * t_sum + w_q * q_sum + (sax + saq)


def _scalars(sax, saq, n, d):
    sax = jnp.asarray(sax, jnp.float32)
    saq = jnp.asarray(saq, jnp.float32)
    w_t = jnp.exp(-sax) / (3.0 * n)
    w_q = jnp.exp(-saq) / ((d - 3.0) * n)
    return jnp.stack([sax, saq, w_t, w_q])                      # (4,) -> SMEM


def _small_path(pred, targ, sax, saq):
    n, d = pred.shape
    # Lane-dense working layout; single stacked input -> one DMA.
    x = jnp.stack([pred.T, targ.T], axis=0)                     # (2, D, N)
    s = _scalars(sax, saq, n, d)
    out = pl.pallas_call(
        functools.partial(_atloc_small_kernel, d=d),
        out_shape=jax.ShapeDtypeStruct((1, 1), jnp.float32),
        in_specs=[
            pl.BlockSpec(memory_space=pltpu.MemorySpace.VMEM),
            pl.BlockSpec(memory_space=pltpu.MemorySpace.SMEM),
        ],
        out_specs=pl.BlockSpec(memory_space=pltpu.MemorySpace.VMEM),
    )(x, s)
    return out[0, 0]


# --------------------------------------------------------------------------
# Large-batch path: no wrapper transpose, (TILE_N, D) blocks, reduction grid
# over N accumulating into a resident (1, D) output block.
# --------------------------------------------------------------------------
def _atloc_tiled_kernel(pred_ref, targ_ref, out_ref):
    @pl.when(pl.program_id(0) == 0)
    def _():
        out_ref[...] = jnp.zeros_like(out_ref)
    out_ref[...] += jnp.sum(jnp.abs(pred_ref[...] - targ_ref[...]),
                            axis=0, keepdims=True)              # (1, D)


def _round_up(x, m):
    return ((x + m - 1) // m) * m


def _tiled_path(pred, targ, sax, saq, tile_n):
    n, d = pred.shape
    tile_n = min(int(tile_n), _round_up(n, 8))
    n_pad = _round_up(n, tile_n)
    if n_pad != n:
        # Zero padding: |0 - 0| = 0 contributes nothing to the sums.
        pred = jnp.pad(pred, ((0, n_pad - n), (0, 0)))
        targ = jnp.pad(targ, ((0, n_pad - n), (0, 0)))

    sums = pl.pallas_call(
        _atloc_tiled_kernel,
        out_shape=jax.ShapeDtypeStruct((1, d), jnp.float32),
        grid=(n_pad // tile_n,),
        in_specs=[
            pl.BlockSpec((tile_n, d), lambda i: (i, 0)),
            pl.BlockSpec((tile_n, d), lambda i: (i, 0)),
        ],
        out_specs=pl.BlockSpec((1, d), lambda i: (0, 0)),
        compiler_params=pltpu.CompilerParams(
            dimension_semantics=("arbitrary",)),
    )(pred, targ)                                               # (1, D)

    sax = jnp.asarray(sax, jnp.float32)
    saq = jnp.asarray(saq, jnp.float32)
    w_t = jnp.exp(-sax) / (3.0 * n)
    w_q = jnp.exp(-saq) / ((d - 3.0) * n)
    return w_t * jnp.sum(sums[0, :3]) + w_q * jnp.sum(sums[0, 3:]) + sax + saq


# --------------------------------------------------------------------------
# Public entry point (dispatch gated on batch size).
# --------------------------------------------------------------------------
_TILED_BATCH_THRESHOLD = 8192  # below this, extra grid steps are pure overhead


def atloc_criterion(pred, targ, sax=0.0, saq=0.0, *,
                    force_tiled=False, tile_n=2048):
    """Pallas implementation of AtLocCriterion.forward (returns scalar loss)."""
    pred = jnp.asarray(pred, jnp.float32)
    targ = jnp.asarray(targ, jnp.float32)
    assert pred.ndim == 2 and pred.shape == targ.shape and pred.shape[1] > 3
    n = pred.shape[0]
    if force_tiled or n >= _TILED_BATCH_THRESHOLD:
        return _tiled_path(pred, targ, sax, saq, tile_n)
    return _small_path(pred, targ, sax, saq)


# ----------------------- pure-JAX reference (for checking) -----------------
def _reference(pred, targ, sax, saq):
    p = jnp.asarray(pred, jnp.float32)
    t = jnp.asarray(targ, jnp.float32)
    l1_t = jnp.mean(jnp.abs(p[:, :3] - t[:, :3]))
    l1_q = jnp.mean(jnp.abs(p[:, 3:] - t[:, 3:]))
    return jnp.exp(-sax) * l1_t + sax + jnp.exp(-saq) * l1_q + saq


if __name__ == "__main__":
    key = jax.random.PRNGKey(0)
    k1, k2, k3, k4 = jax.random.split(key, 4)

    # Small/typical shape: batch of 8 poses, D=6 ([t(3) | log-q(3)]).
    N, D = 8, 6
    pred = 0.5 * jax.random.normal(k1, (N, D), jnp.float32)
    targ = 0.5 * jax.random.normal(k2, (N, D), jnp.float32)

    # Default nn.Parameter values (sax = saq = 0.0) -> gridless path.
    loss = jax.block_until_ready(atloc_criterion(pred, targ, 0.0, 0.0))
    ref = jax.block_until_ready(_reference(pred, targ, 0.0, 0.0))
    assert jnp.allclose(loss, ref, atol=1e-5, rtol=1e-5), (float(loss), float(ref))

    # Non-trivial learned betas to exercise the weight path.
    loss2 = jax.block_until_ready(atloc_criterion(pred, targ, -3.0, 3.0))
    ref2 = jax.block_until_ready(_reference(pred, targ, -3.0, 3.0))
    assert jnp.allclose(loss2, ref2, atol=1e-5, rtol=1e-5), (float(loss2), float(ref2))

    # Exercise the large-batch (no-transpose, gridded-reduction) path at a
    # small deterministic shape: N=300 padded to 384 with TILE_N=128 (3 steps).
    N2 = 300
    pred2 = 0.5 * jax.random.normal(k3, (N2, D), jnp.float32)
    targ2 = 0.5 * jax.random.normal(k4, (N2, D), jnp.float32)
    loss3 = jax.block_until_ready(
        atloc_criterion(pred2, targ2, 0.5, -0.5, force_tiled=True, tile_n=128))
    ref3 = jax.block_until_ready(_reference(pred2, targ2, 0.5, -0.5))
    assert jnp.allclose(loss3, ref3, atol=1e-5, rtol=1e-5), (float(loss3), float(ref3))

    print("KERNEL_OK")
</pallas_src>

<mosaic_0001>
module attributes {stable_mosaic.version = 11 : i64} {
  func.func @_atloc_small_kernel(%arg0: memref<2x6x8xf32, #tpu.memory_space<vmem>>, %arg1: memref<4xf32, #tpu.memory_space<smem>>, %arg2: memref<1x1xf32, #tpu.memory_space<vmem>>) attributes {dimension_semantics = [], scalar_prefetch = 0 : i64, scratch_operands = 0 : i64, tpu.core_type = #tpu.core_type<tc>} {
    %c0 = arith.constant 0 : index
    %c0_0 = arith.constant 0 : index
    %c0_1 = arith.constant 0 : index
    %0 = vector.load %arg0[%c0, %c0_0, %c0_1] : memref<2x6x8xf32, #tpu.memory_space<vmem>>, vector<1x6x8xf32>
    %1 = vector.shape_cast %0 : vector<1x6x8xf32> to vector<6x8xf32>
    %c1 = arith.constant 1 : index
    %c0_2 = arith.constant 0 : index
    %c0_3 = arith.constant 0 : index
    %2 = vector.load %arg0[%c1, %c0_2, %c0_3] : memref<2x6x8xf32, #tpu.memory_space<vmem>>, vector<1x6x8xf32>
    %3 = vector.shape_cast %2 : vector<1x6x8xf32> to vector<6x8xf32>
    %4 = arith.subf %1, %3 : vector<6x8xf32>
    %5 = math.absf %4 : vector<6x8xf32>
    %cst = arith.constant dense<0.000000e+00> : vector<6xf32>
    %6 = vector.multi_reduction <add>, %5, %cst [1] : vector<6x8xf32> to vector<6xf32>
    %7 = vector.shape_cast %6 : vector<6xf32> to vector<6x1xf32>
    %8 = vector.extract_strided_slice %7 {offsets = [0, 0], sizes = [3, 1], strides = [1, 1]} : vector<6x1xf32> to vector<3x1xf32>
    %cst_4 = arith.constant dense<0.000000e+00> : vector<1xf32>
    %9 = vector.multi_reduction <add>, %8, %cst_4 [0] : vector<3x1xf32> to vector<1xf32>
    %10 = vector.shape_cast %9 : vector<1xf32> to vector<1x1xf32>
    %11 = vector.extract_strided_slice %7 {offsets = [3, 0], sizes = [3, 1], strides = [1, 1]} : vector<6x1xf32> to vector<3x1xf32>
    %cst_5 = arith.constant dense<0.000000e+00> : vector<1xf32>
    %12 = vector.multi_reduction <add>, %11, %cst_5 [0] : vector<3x1xf32> to vector<1xf32>
    %13 = vector.shape_cast %12 : vector<1xf32> to vector<1x1xf32>
    %c0_6 = arith.constant 0 : index
    %14 = memref.load %arg1[%c0_6] : memref<4xf32, #tpu.memory_space<smem>>
    %c1_7 = arith.constant 1 : index
    %15 = memref.load %arg1[%c1_7] : memref<4xf32, #tpu.memory_space<smem>>
    %c2 = arith.constant 2 : index
    %16 = memref.load %arg1[%c2] : memref<4xf32, #tpu.memory_space<smem>>
    %c3 = arith.constant 3 : index
    %17 = memref.load %arg1[%c3] : memref<4xf32, #tpu.memory_space<smem>>
    %18 = vector.broadcast %16 : f32 to vector<1x1xf32>
    %19 = arith.mulf %18, %10 : vector<1x1xf32>
    %20 = vector.broadcast %17 : f32 to vector<1x1xf32>
    %21 = arith.mulf %20, %13 : vector<1x1xf32>
    %22 = arith.addf %19, %21 : vector<1x1xf32>
    %23 = arith.addf %14, %15 : f32
    %24 = vector.broadcast %23 : f32 to vector<1x1xf32>
    %25 = arith.addf %22, %24 : vector<1x1xf32>
    %c0_8 = arith.constant 0 : index
    %c0_9 = arith.constant 0 : index
    %26 = vector.load %arg2[%c0_8, %c0_9] : memref<1x1xf32, #tpu.memory_space<vmem>>, vector<1x1xf32>
    tpu.vector_store %arg2[%c0_8, %c0_9], %25 {strides = array<i32>} : memref<1x1xf32, #tpu.memory_space<vmem>>, vector<1x1xf32>,
    return
  }
}

</mosaic_0001>

<bundles_post_ra>
// kernel: tpu_custom_call.1
= control target key start
LH: loop header
LB: loop body
LE: loop exit
PB: predicated region body
PF: predicated region fallthrough
CT: control target
= control target key end

     0   :  { %7 = vsyncpa [#allocation4], 0  ;;  %s163_s0 = inlined_call_operand.vmem [shape: f32[2,6,8], index: 0, kind: input, shape index: {}]   ;;  %s164_s1 = inlined_call_operand.vmem [shape: f32[4], index: 1, kind: input, shape index: {}]   ;;  %s165_s2 = inlined_call_operand.hbm [shape: f32[1,1], index: 2, kind: output, shape index: {}]  }
   0x1   :  { %8 = vsyncpa [#allocation3], 0  ;;  %s17_s11 = sshll.u32 %s164_s1, 4  ;;  %s18_s11 = int_to_ptr.vmem [resolvable:$true] %s17_s11 }
   0x2   :  { %s87_s12 = scalar_lea.vmem %s18_s11, 16  ;;  %p92_p1 = scmp.lt.s32.totalorder %s18_s11, %s18_s11 }
   0x3   :  { %p88_p0 = scmp.ne.s32.totalorder %s18_s11, %s87_s12  ;;  %p93_p2 = scmp.lt.s32.totalorder %s87_s12, %s87_s12 }
   0x5   :  { %p94_p3 = por %p93_p2, %p92_p1 }
   0x7   :  { %p95_p4 = pnand %p94_p3, %p88_p0 }
   0x9   :  { %98 = shalt.err (!%p95_p4)
}
   0xa   :  { %s125_s13 = smov [#allocation2]  }
   0xb   :  { %20 = dma.vmem_to_smem %s18_s11, 16, %s125_s13, [#allocation4]  }
   0xc   :  { %121 = dma.done.wait [#allocation4], 16  }
   0xd   :  { %122 = vsyncadd [#allocation4], 4294967280 }
   0xe   :  { %24 = sfence }
   0xf   :  { %v25_v0 = vld [vmem:[%s163_s0] sm:$0x3f]  ;;  %v81_v1 = vld [vmem:[%s163_s0 + $0x8] sm:$0x3f]  ;;  %vm30_vm0 = vcmask 62464   ;;  %vm34_vm1 = vcmask 1042432  }
  0x10   :  { %v28_v2 = vsub.f32 %v25_v0, %v81_v1  ;;  %s83_s1 = sld [smem:[#allocation2 + $0x2]]  ;;  %s84_s18 = sld [smem:[#allocation2 + $0x3]]  ;;  %vm64_vm2 = vcmask 0  }
  0x11   :  { %s52_s19 = sld [smem:[#allocation2]]  ;;  %s82_s20 = sld [smem:[#allocation2 + $0x1]] }
  0x12   :  { %v29_v3 = vand.u32 2147483647, %v28_v2  ;;  %s126_s21 = smov [#allocation5]  }
  0x13   :  { %s72_s22 = sshll.u32 %s126_s21, 4  ;;  %s73_s22 = int_to_ptr.vmem [resolvable:$true] %s72_s22 }
  0x14   :  { %v31_v4 = vsel %vm30_vm0, %v29_v3, 0.0  ;;  %s99_s23 = scalar_lea.vmem %s73_s22, 16  ;;  %s103_s24 = scalar_lea.vmem %s73_s22, 32 }
  0x15   :  { %32 = vadd.xlane.f32.xlu0 %v31_v4  ;;  %p100_p5 = scmp.ne.s32.totalorder %s73_s22, %s99_s23  ;;  %p104_p6 = scmp.lt.s32.totalorder %s73_s22, %s73_s22 }
  0x16   :  { %v56_v20 = vstv %s83_s1  ;;  %v58_v21 = vstv %s84_s18  ;;  %p105_p7 = scmp.lt.s32.totalorder %s103_s24, %s99_s23 }
  0x17   :  { %s61_s0 = sadd.f32 %s82_s20, %s52_s19 }
  0x18   :  { %p106_p8 = por %p105_p7, %p104_p6 }
  0x19   :  { %v62_v25 = vstv %s61_s0 }
  0x1a   :  { %p107_p9 = pnand %p106_p8, %p100_p5 }
  0xa2   :  { %v33_v5 = vpop.xlane.xlu0 %32 }
  0xa3   :  { %v35_v6 = vsel %vm34_vm1, %v33_v5, 0.0  ;;  %v43_v7 = vrot.slane %v33_v5, 3 }
  0xa4   :  { %v36_v8 = vrot.slane %v35_v6, 4 }
  0xa5   :  { %v45_v9 = vsel %vm34_vm1, %v43_v7, 0.0 }
  0xa6   :  { %v37_v10 = vadd.f32 %v36_v8, %v35_v6  ;;  %v46_v11 = vrot.slane %v45_v9, 4 }
  0xa8   :  { %v38_v12 = vrot.slane %v37_v10, 2  ;;  %v47_v13 = vadd.f32 %v46_v11, %v45_v9 }
  0xaa   :  { %v39_v14 = vadd.f32 %v38_v12, %v37_v10  ;;  %v48_v15 = vrot.slane %v47_v13, 2 }
  0xac   :  { %v40_v16 = vrot.slane %v39_v14, 1  ;;  %v49_v17 = vadd.f32 %v48_v15, %v47_v13 }
  0xae   :  { %v41_v18 = vadd.f32 %v40_v16, %v39_v14  ;;  %v50_v19 = vrot.slane %v49_v17, 1 }
  0xb0   :  { %v51_v22 = vadd.f32 %v50_v19, %v49_v17  ;;  %v57_v23 = vmul.f32 %v56_v20, %v41_v18 }
  0xb2   :  { %v59_v24 = vmul.f32 %v58_v21, %v51_v22 }
  0xb4   :  { %v60_v26 = vadd.f32 %v59_v24, %v57_v23 }
  0xb6   :  { %v63_v27 = vadd.f32 %v62_v25, %v60_v26 }
  0xb8   :  { %65 = vst.msk [vmem:[#allocation5] sm:$0x1] %vm64_vm2, %v63_v27 }
  0xb9   :  { %110 = shalt.err (!%p107_p9)
}
  0xba   :  { %s111_s27 = scalar_lea.hbm %s165_s2, 16 }
  0xbb   :  { %p112_p10 = scmp.ne.s32.totalorder %s165_s2, %s111_s27  ;;  %p115_p11 = scmp.lt.u32.totalorder %s111_s27, %s165_s2 }
  0xbd   :  { %p117_p12 = pnand %p115_p11, %p112_p10 }
  0xbf   :  { %120 = shalt.err (!%p117_p12)
}
  0xc0   :  { %75 = dma.vmem_to_hbm [thread:$0]  %s73_s22, 16, %s165_s2, [#allocation3]  }
  0xc1   :  { %123 = dma.done.wait [#allocation3], 16  }
  0xc2   :  { %124 = vsyncadd [#allocation3], 4294967280 }
  0xc3   :  { %79 = vsyncpa [#allocation3], 1 }
  0xc4   :  { %80 = vsyncpa [#allocation4], 1 }

</bundles_post_ra>
